<compile_context>
chip_gen: v7x
topology: tpu7x:2x2x1
jax: 0.10.0
libtpu: 0.0.40
codegen_flags: <defaults>
</compile_context>

<pallas_src>
import functools

import jax
import jax.numpy as jnp
from jax.experimental import pallas as pl
from jax.experimental.pallas import tpu as pltpu


def _rgcn_kernel(adj_ref, x_ref, w_ref, y_ref, *, n, k_order, out_channels):
    f32 = jnp.float32

    x = x_ref[...]        # [N, F]          f32
    adj = adj_ref[...]    # [2N, 2N]        f32, block-diag(T_fwd, T_bwd)
    w = w_ref[...]        # [(2K-1)F+1, 2C+1] f32 packed slab

    # --- Stacked Chebyshev recurrence: one matmul per order covers both directions. ---
    # T_0 = [x; x], T_1 = Adiag @ T_0, T_k = 2 Adiag T_{k-1} - T_{k-2}
    x2 = jnp.concatenate([x, x], axis=0)                       # [2N, F]
    stacked = []                                               # T_1 .. T_{K-1}
    t_prev2, t_prev1 = None, x2
    for k in range(1, k_order):
        t_k = jnp.dot(adj, t_prev1, preferred_element_type=f32)
        if k > 1:
            t_k = 2.0 * t_k - t_prev2
        stacked.append(t_k)
        t_prev2, t_prev1 = t_prev1, t_k

    # --- Fused gate contraction: bases lane-concatenated, single MXU matmul. ---
    # Basis/weight-row order: [T0 (shared), fwd k=1..K-1, bwd k=1..K-1, bias row].
    ones_n = jnp.ones((n, 1), f32)
    parts = [x] + [t[:n] for t in stacked] + [t[n:] for t in stacked] + [ones_n]
    bases = jnp.concatenate(parts, axis=1)                     # [N, (2K-1)*F + 1]

    c2 = 2 * out_channels
    gates = jnp.dot(bases, w[:, :c2], preferred_element_type=f32)   # [N, 2C]

    z = jax.nn.sigmoid(gates[:, :out_channels])
    h_tilde = jnp.tanh(gates[:, out_channels:])
    # H=None -> h0 == 0: h_new = z*0 + (1-z)*h_tilde, and the r gate is unused.
    h4 = jnp.maximum((1.0 - z) * h_tilde, 0.0)                 # ReLU

    # --- Linear(out_channels -> 1) head with bias folded via a ones column. ---
    h4_aug = jnp.concatenate([h4, ones_n], axis=1)             # [N, C+1]
    wl_aug = w[:out_channels + 1, c2:c2 + 1]                   # [C+1, 1] = [wl; bl]
    # TODO(synk): [N, 1] output is a masked 1-lane store; negligible at N=16 but emit
    # h4 [N, C] and do the head in XLA if N / batch grows.
    y_ref[...] = jnp.dot(h4_aug, wl_aug, preferred_element_type=f32)


def init_params(key, num_features=35, out_channels=5, num_filters=2):
    """Mirrors the torch module's parameter set (incl. r-gate / W*h weights, which the
    H=None forward never touches)."""
    def glorot(k, shape):
        fan_in, fan_out = shape[-2], shape[-1]
        lim = jnp.sqrt(6.0 / (fan_in + fan_out))
        return jax.random.uniform(k, shape, jnp.float32, -lim, lim)

    keys = jax.random.split(key, 12)
    p = {}
    for i, g in enumerate(("z", "r", "h")):
        p[f"w{g}x"] = glorot(keys[3 * i + 0], (2, num_filters, num_features, out_channels))
        p[f"w{g}h"] = glorot(keys[3 * i + 1], (2, num_filters, out_channels, out_channels))
        p[f"b{g}"] = jax.random.uniform(keys[3 * i + 2], (1, out_channels),
                                        jnp.float32, -0.1, 0.1)
    p["wl"] = glorot(keys[9], (out_channels, 1))
    p["bl"] = jax.random.uniform(keys[10], (1, 1), jnp.float32, -0.1, 0.1)
    return p


def pack_params(params):
    """Pack everything the H=None forward needs into ONE f32 slab.

    Shape [(2K-1)*F + 1, 2C + 1]:
      * columns 0..2C-1 : stacked z / h_tilde gate weights per basis term, with the
        direction-shared T0 weights summed and the gate biases in the last row
        (matched by the kernel's ones column on the bases).
      * column 2C, rows 0..C : [wl; bl] for the Linear head.
    Only the X-path weights are packed because H=None => h == 0 (all W*h terms and the
    entire r gate vanish).  Call this ONCE; it is hoisted out of the per-call forward.
    """
    wzx, whx = params["wzx"], params["whx"]            # [2, K, F, C]
    k_order, c = wzx.shape[1], wzx.shape[3]

    def per_gate(wx):
        blocks = [wx[0, 0] + wx[1, 0]]                 # shared T0 = x term
        blocks += [wx[0, k] for k in range(1, k_order)]
        blocks += [wx[1, k] for k in range(1, k_order)]
        return jnp.concatenate(blocks, axis=0)         # [(2K-1)*F, C]

    w_gate = jnp.concatenate([per_gate(wzx), per_gate(whx)], axis=-1)   # [(2K-1)F, 2C]
    b_gate = jnp.concatenate([params["bz"], params["bh"]], axis=-1)     # [1, 2C]
    w_gate = jnp.concatenate([w_gate, b_gate], axis=0)                  # [(2K-1)F+1, 2C]

    wl_aug = jnp.concatenate([params["wl"], params["bl"]], axis=0)      # [C+1, 1]
    head_col = jnp.zeros((w_gate.shape[0], 1), jnp.float32).at[:c + 1, :].set(wl_aug)
    return jnp.concatenate([w_gate, head_col], axis=1).astype(jnp.float32)


@functools.partial(jax.jit, static_argnames=("k_order", "out_channels"))
def recurrent_gcn_forward(x, edge_index, edge_weight, w_all, *, k_order, out_channels):
    n = x.shape[0]

    # Glue (XLA): densify the sparse graph, build the two diffusion transitions, and
    # pack them into one block-diagonal operand (fused fwd/bwd diffusion matmuls).
    a = jnp.zeros((n, n), jnp.float32).at[edge_index[0], edge_index[1]].add(
        edge_weight.astype(jnp.float32))
    deg_out = a.sum(axis=1)
    deg_in = a.sum(axis=0)
    t_f = a / jnp.where(deg_out == 0.0, 1.0, deg_out)[:, None]
    t_b = a.T / jnp.where(deg_in == 0.0, 1.0, deg_in)[:, None]
    adj_diag = (jnp.zeros((2 * n, 2 * n), jnp.float32)
                .at[:n, :n].set(t_f)
                .at[n:, n:].set(t_b))

    vmem = pl.BlockSpec(memory_space=pltpu.MemorySpace.VMEM)
    kernel = functools.partial(_rgcn_kernel, n=n, k_order=k_order,
                               out_channels=out_channels)
    y = pl.pallas_call(
        kernel,
        out_shape=jax.ShapeDtypeStruct((n, 1), jnp.float32),
        in_specs=[vmem, vmem, vmem],
        out_specs=vmem,
    )(adj_diag, x.astype(jnp.float32), w_all)
    return y, a


if __name__ == "__main__":
    key = jax.random.PRNGKey(0)
    k_x, k_e, k_w, k_p = jax.random.split(key, 4)

    num_nodes, num_features, out_channels, num_filters = 16, 35, 5, 2
    num_edges = 48

    x = jax.random.normal(k_x, (num_nodes, num_features), jnp.float32)
    edge_index = jax.random.randint(k_e, (2, num_edges), 0, num_nodes, jnp.int32)
    edge_weight = jax.random.uniform(k_w, (num_edges,), jnp.float32, 0.1, 1.0)

    params = init_params(k_p, num_features, out_channels, num_filters)
    w_all = pack_params(params)   # hoisted: packed once, reused for every forward call

    y, A = recurrent_gcn_forward(x, edge_index, edge_weight, w_all,
                                 k_order=num_filters, out_channels=out_channels)
    jax.block_until_ready((y, A))

    assert y.shape == (num_nodes, 1) and y.dtype == jnp.float32
    assert A.shape == (num_nodes, num_nodes)
    print("KERNEL_OK")
</pallas_src>

<mosaic_0001>
module attributes {stable_mosaic.version = 11 : i64} {
  func.func private @main(%arg0: i32) attributes {dimension_semantics = [#tpu.dimension_semantics<core_parallel>], iteration_bounds = array<i64: 2>, tpu.core_type = #tpu.core_type<sc_scalar_subcore>, window_params = []} {
    return
  }
}

module attributes {stable_mosaic.version = 11 : i64} {
  func.func private @main(%arg0: i32) attributes {dimension_semantics = [#tpu.dimension_semantics<core_parallel>], iteration_bounds = array<i64: 2>, tpu.core_type = #tpu.core_type<sc_scalar_subcore>, window_params = []} {
    return
  }
}

module attributes {stable_mosaic.version = 11 : i64} {
  func.func @_rgcn_kernel(%arg0: memref<32x32xf32, #tpu.memory_space<vmem>>, %arg1: memref<16x35xf32, #tpu.memory_space<vmem>>, %arg2: memref<106x11xf32, #tpu.memory_space<vmem>>, %arg3: memref<16x1xf32, #tpu.memory_space<vmem>>) attributes {dimension_semantics = [], scalar_prefetch = 0 : i64, scratch_operands = 0 : i64, tpu.core_type = #tpu.core_type<tc>} {
    %c0 = arith.constant 0 : index
    %c0_0 = arith.constant 0 : index
    %0 = vector.load %arg1[%c0, %c0_0] : memref<16x35xf32, #tpu.memory_space<vmem>>, vector<16x35xf32>
    %c0_1 = arith.constant 0 : index
    %c0_2 = arith.constant 0 : index
    %1 = vector.load %arg0[%c0_1, %c0_2] : memref<32x32xf32, #tpu.memory_space<vmem>>, vector<32x32xf32>
    %c0_3 = arith.constant 0 : index
    %c0_4 = arith.constant 0 : index
    %2 = vector.load %arg2[%c0_3, %c0_4] : memref<106x11xf32, #tpu.memory_space<vmem>>, vector<106x11xf32>
    %3 = tpu.concatenate %0, %0 in 0 : vector<16x35xf32>, vector<16x35xf32> -> vector<32x35xf32>
    %cst = arith.constant dense<0.000000e+00> : vector<32x35xf32>
    %4 = tpu.matmul %1, %3, %cst {dimension_numbers = #tpu.dot_dimension_numbers<[1], [0], [0], [1], [0, 0, 1, 1], [], []>} : vector<32x32xf32>, vector<32x35xf32>, vector<32x35xf32> -> vector<32x35xf32>
    %cst_5 = arith.constant 1.000000e+00 : f32
    %5 = vector.broadcast %cst_5 : f32 to vector<16x1xf32>
    %6 = vector.extract_strided_slice %4 {offsets = [0, 0], sizes = [16, 35], strides = [1, 1]} : vector<32x35xf32> to vector<16x35xf32>
    %7 = vector.extract_strided_slice %4 {offsets = [16, 0], sizes = [16, 35], strides = [1, 1]} : vector<32x35xf32> to vector<16x35xf32>
    %8 = tpu.concatenate %0, %6, %7, %5 in 1 : vector<16x35xf32>, vector<16x35xf32>, vector<16x35xf32>, vector<16x1xf32> -> vector<16x106xf32>
    %9 = vector.extract_strided_slice %2 {offsets = [0, 0], sizes = [106, 10], strides = [1, 1]} : vector<106x11xf32> to vector<106x10xf32>
    %cst_6 = arith.constant dense<0.000000e+00> : vector<16x10xf32>
    %10 = tpu.matmul %8, %9, %cst_6 {dimension_numbers = #tpu.dot_dimension_numbers<[1], [0], [0], [1], [0, 0, 1, 1], [], []>} : vector<16x106xf32>, vector<106x10xf32>, vector<16x10xf32> -> vector<16x10xf32>
    %11 = vector.extract_strided_slice %10 {offsets = [0, 0], sizes = [16, 5], strides = [1, 1]} : vector<16x10xf32> to vector<16x5xf32>
    %12 = arith.negf %11 : vector<16x5xf32>
    %13 = math.exp %12 : vector<16x5xf32>
    %cst_7 = arith.constant 1.000000e+00 : f32
    %14 = vector.broadcast %cst_7 : f32 to vector<16x5xf32>
    %15 = arith.addf %14, %13 : vector<16x5xf32>
    %16 = arith.divf %14, %15 : vector<16x5xf32>
    %17 = vector.extract_strided_slice %10 {offsets = [0, 5], sizes = [16, 5], strides = [1, 1]} : vector<16x10xf32> to vector<16x5xf32>
    %18 = math.tanh %17 : vector<16x5xf32>
    %cst_8 = arith.constant 1.000000e+00 : f32
    %19 = vector.broadcast %cst_8 : f32 to vector<16x5xf32>
    %20 = arith.subf %19, %16 : vector<16x5xf32>
    %21 = arith.mulf %20, %18 : vector<16x5xf32>
    %cst_9 = arith.constant 0.000000e+00 : f32
    %22 = vector.broadcast %cst_9 : f32 to vector<16x5xf32>
    %23 = arith.maximumf %21, %22 : vector<16x5xf32>
    %24 = tpu.concatenate %23, %5 in 1 : vector<16x5xf32>, vector<16x1xf32> -> vector<16x6xf32>
    %25 = vector.extract_strided_slice %2 {offsets = [0, 10], sizes = [6, 1], strides = [1, 1]} : vector<106x11xf32> to vector<6x1xf32>
    %cst_10 = arith.constant dense<0.000000e+00> : vector<16x1xf32>
    %26 = tpu.matmul %24, %25, %cst_10 {dimension_numbers = #tpu.dot_dimension_numbers<[1], [0], [0], [1], [0, 0, 1, 1], [], []>} : vector<16x6xf32>, vector<6x1xf32>, vector<16x1xf32> -> vector<16x1xf32>
    %c0_11 = arith.constant 0 : index
    %c0_12 = arith.constant 0 : index
    %27 = vector.load %arg3[%c0_11, %c0_12] : memref<16x1xf32, #tpu.memory_space<vmem>>, vector<16x1xf32>
    tpu.vector_store %arg3[%c0_11, %c0_12], %26 {strides = array<i32>} : memref<16x1xf32, #tpu.memory_space<vmem>>, vector<16x1xf32>,
    return
  }
}

</mosaic_0001>

<bundles_post_ra>
// kernel: recurrent_gcn_forward.1
= control target key start
LH: loop header
LB: loop body
LE: loop exit
PB: predicated region body
PF: predicated region fallthrough
CT: control target
= control target key end

     0   :  { %vm34_vm0 = vcmask 261120   ;;  %vm164_vm1 = vcmask 1041408   ;;  %vm513_vm2 = vmmov 1   ;;  %s514_s22 = smov 35   ;;  %s515_s23 = smov 70   ;;  %vm148_vm4 = vcmask 285696   ;;  %s616_s1 = inlined_call_operand.vmem [shape: f32[16,35], index: 1, kind: input, shape index: {}]   ;;  %s617_s0 = inlined_call_operand.vmem [shape: f32[32,32], index: 0, kind: input, shape index: {}]   ;;  %s618_s2 = inlined_call_operand.vmem [shape: f32[106,11], index: 2, kind: input, shape index: {}]   ;;  %s619_s3 = inlined_call_operand.vmem [shape: f32[16,1], index: 3, kind: output, shape index: {}]  }
   0x1   :  { %v541_v0 = vld [vmem:[%s616_s1] sm:$0xff]  ;;  %v546_v1 = vld [vmem:[%s616_s1 + $0x8] sm:$0xff]  ;;  %v18_v5 = vld [vmem:[%s617_s0 + $0x10] sm:$0xff]  ;;  %vm151_vm5 = vcmask 572416   ;;  %vm154_vm6 = vcmask 859136   ;;  %vm157_vm7 = vcmask 867328  }
   0x2   :  { %v16_v2 = vld [vmem:[%s617_s0] sm:$0xff]  ;;  %v458_v3 = vpack.c.bf16 %v546_v1, %v541_v0  ;;  %v17_v4 = vld [vmem:[%s617_s0 + $0x8] sm:$0xff]  ;;  %v19_v6 = vld [vmem:[%s617_s0 + $0x18] sm:$0xff]  ;;  %s517_s24 = smov 118   ;;  %vm271_vm8 = vcmask 39936   ;;  %vm284_vm9 = vcmask 1045504  }
   0x3   :  { %416 = vmatprep.mubr.msk.f32.mxu0 %vm34_vm0, %v16_v2  ;;  %v565_v7 = vld [vmem:[%s618_s2] sm:$0xff]  ;;  %v21_v8 = vld [vmem:[%s618_s2 + $0x8] sm:$0xff]  ;;  %v22_v9 = vld [vmem:[%s618_s2 + $0x10] sm:$0xff]  ;;  %vm277_vm10 = vcmask 48128   ;;  %vm362_vm11 = vcmask 7168  }
   0x4   :  { %459 = vmatprep.subr.bf16.mxu0 %v458_v3  ;;  %v466_v10 = vpack.c.bf16 %v21_v8, %v565_v7  ;;  %v23_v11 = vld [vmem:[%s618_s2 + $0x18] sm:$0xff]  ;;  %v24_v13 = vld [vmem:[%s618_s2 + $0x20] sm:$0xff]  ;;  %v25_v14 = vld [vmem:[%s618_s2 + $0x28] sm:$0xff] }
   0x5   :  { %461 = vmatpush3.bf16.msra.mxu0 %v458_v3  ;;  %v470_v12 = vpack.c.bf16 %v23_v11, %v22_v9  ;;  %v474_v15 = vpack.c.bf16 %v25_v14, %v24_v13  ;;  %v26_v16 = vld [vmem:[%s618_s2 + $0x30] sm:$0xff]  ;;  %v27_v17 = vld [vmem:[%s618_s2 + $0x38] sm:$0xff]  ;;  %v28_v19 = vld [vmem:[%s618_s2 + $0x40] sm:$0xff] }
   0x6   :  { %463 = vmatprep.subr.bf16.mxu0 %v458_v3  ;;  %467 = vmatprep.subr.bf16.mxu1 %v466_v10  ;;  %v478_v18 = vpack.c.bf16 %v27_v17, %v26_v16  ;;  %v29_v20 = vld [vmem:[%s618_s2 + $0x48] sm:$0xff]  ;;  %v30_v22 = vld [vmem:[%s618_s2 + $0x50] sm:$0xff]  ;;  %v31_v23 = vld [vmem:[%s618_s2 + $0x58] sm:$0xff] }
   0x7   :  { %469 = vmatpush3.bf16.msra.mxu1 %v466_v10  ;;  %v482_v21 = vpack.c.bf16 %v29_v20, %v28_v19  ;;  %v486_v24 = vpack.c.bf16 %v31_v23, %v30_v22  ;;  %v32_v25 = vld [vmem:[%s618_s2 + $0x60] sm:$0xff]  ;;  %v33_v26 = vld [vmem:[%s618_s2 + $0x68] sm:$0x3]  ;;  %vm491_vm3 = vmpackc.low %vm164_vm1, %vm513_vm2  ;;  %s516_s2 = smov 123  }
   0x8   :  { %471 = vmatprep.subr.bf16.mxu1 %v470_v12  ;;  %v490_v27 = vpack.c.bf16 %v33_v26, %v32_v25 }
   0x9   :  { %465 = vmatpush3.bf16.msra.mxu0 %v458_v3 }
   0xb   :  { %473 = vmatpush3.bf16.msra.mxu1 %v470_v12 }
   0xc   :  { %417 = vmatmul.mubr.msk.f32.vlgmr.msra.gmra.mrb[0].mxu0 %vm34_vm0, %v17_v4  ;;  %475 = vmatprep.subr.bf16.mxu1 %v474_v15 }
   0xd   :  { %419 = vmatprep.mubr.msk.f32.mxu0 %vm34_vm0, %v18_v5 }
   0xf   :  { %477 = vmatpush3.bf16.msra.mxu1 %v474_v15 }
  0x10   :  { %420 = vmatmul.mubr.msk.f32.gmra.mrb[2].mxu0 %vm34_vm0, %v19_v6  ;;  %479 = vmatprep.subr.bf16.mxu1 %v478_v18 }
  0x13   :  { %481 = vmatpush3.bf16.msra.mxu1 %v478_v18 }
  0x14   :  { %483 = vmatprep.subr.bf16.mxu1 %v482_v21 }
  0x17   :  { %485 = vmatpush3.bf16.msra.mxu1 %v482_v21 }
  0x18   :  { %487 = vmatprep.subr.bf16.mxu1 %v486_v24 }
  0x1b   :  { %489 = vmatpush3.bf16.msra.mxu1 %v486_v24 }
  0x1c   :  { %492 = vmatprep.subr.msk.bf16.mxu1 %vm491_vm3, %v490_v27 }
  0x1f   :  { %495 = vmatpush3.bf16.msk.msra.mxu1 %vm491_vm3, %v490_v27 }
  0xdf   :  { %v418_v28 = vpop.f32.mrb[0].mxu0 }
  0xe0   :  { %v113_v29 = vpop.f32.mrb[1].mxu0 }
  0xe1   :  { %134 = vrot.lane.b32.xlu0 %v113_v29, %s514_s22 }
  0xe3   :  { %v421_v30 = vpop.f32.mrb[2].mxu0 }
  0xe4   :  { %v123_v31 = vpop.f32.mrb[3].mxu0 }
  0xe5   :  { %136 = vrot.lane.b32.xlu0 %v418_v28, %s514_s22  ;;  %142 = vrot.lane.b32.xlu1 %v123_v31, %s515_s23 }
  0xe9   :  { %144 = vrot.lane.b32.xlu1 %v421_v30, %s515_s23 }
 0x153   :  { %v135_v32 = vpop.permute.xlu0 %134 }
 0x154   :  { %v149_v33 = vsel %vm148_vm4, %v541_v0, %v135_v32 }
 0x157   :  { %v143_v34 = vpop.permute.xlu1 %142  ;;  %v137_v35 = vpop.permute.xlu0 %136 }
 0x158   :  { %v152_v36 = vsel %vm151_vm5, %v149_v33, %v143_v34  ;;  %v150_v38 = vsel %vm148_vm4, %v546_v1, %v137_v35 }
 0x159   :  { %v155_v37 = vsel %vm154_vm6, %v152_v36, 1.0 }
 0x15a   :  { %450 = vmatprep.mubr.msk.f32.mxu1 %vm157_vm7, %v155_v37 }
 0x15b   :  { %v145_v39 = vpop.permute.xlu1 %144 }
 0x15c   :  { %v153_v40 = vsel %vm151_vm5, %v150_v38, %v145_v39 }
 0x15d   :  { %v156_v41 = vsel %vm154_vm6, %v153_v40, 1.0 }
 0x15e   :  { %451 = vmatmul.mubr.msk.f32.vlgmr.msra.gmra.mrb[0].mxu1 %vm157_vm7, %v156_v41 }
 0x231   :  { %v452_v42 = vpop.f32.mrb[0].mxu1 }
 0x232   :  { %501 = vtanh.f32 %v452_v42  ;;  %v234_v43 = vpop.f32.mrb[1].mxu1  ;;  %v377_v46 = vmul.f32 -1.442695, %v452_v42 }
 0x233   :  { %503 = vtanh.f32 %v234_v43  ;;  %v376_v47 = vmul.f32 -1.442695, %v234_v43 }
 0x234   :  { %505 = vpow2.f32 %v377_v46 }
 0x235   :  { %507 = vpow2.f32 %v376_v47 }
 0x23c   :  { %v502_v44 = vpop.eup %501 }
 0x23d   :  { %v504_v45 = vpop.eup %503  ;;  %263 = vrot.lane.b32.xlu1 %v502_v44, %s516_s2 }
 0x23e   :  { %261 = vrot.lane.b32.xlu0 %v504_v45, %s516_s2  ;;  %v506_v48 = vpop.eup %505 }
 0x23f   :  { %v508_v49 = vpop.eup %507  ;;  %v250_v50 = vadd.f32 1.0, %v506_v48 }
 0x240   :  { %v249_v51 = vadd.f32 1.0, %v508_v49 }
 0x241   :  { %509 = vrcp.f32 %v250_v50 }
 0x242   :  { %275 = vrot.lane.b32.xlu0 %v565_v7, %s517_s24  ;;  %511 = vrcp.f32 %v249_v51 }
 0x24b   :  { %v510_v52 = vpop.eup %509 }
 0x24c   :  { %v512_v53 = vpop.eup %511  ;;  %v258_v54 = vsub.f32 1.0, %v510_v52 }
 0x24d   :  { %v257_v56 = vsub.f32 1.0, %v512_v53 }
 0x2af   :  { %v264_v55 = vpop.permute.xlu1 %263 }
 0x2b0   :  { %v268_v57 = vmul.f32 %v264_v55, %v258_v54  ;;  %v262_v58 = vpop.permute.xlu0 %261 }
 0x2b1   :  { %v267_v59 = vmul.f32 %v262_v58, %v257_v56 }
 0x2b2   :  { %v270_v60 = vmax.f32 %v268_v57, 0.0 }
 0x2b3   :  { %v269_v61 = vmax.f32 %v267_v59, 0.0 }
 0x2b4   :  { %v276_v62 = vpop.permute.xlu0 %275  ;;  %v273_v0 = vsel %vm271_vm8, %v270_v60, 1.0 }
 0x2b5   :  { %v272_v63 = vsel %vm271_vm8, %v269_v61, 1.0  ;;  %453 = vmatprep.subr.msk.mxu0 %vm284_vm9, %v276_v62 }
 0x2b6   :  { %454 = vmatpush3.msk.msra.mxu0 %vm284_vm9, %v276_v62  ;;  %455 = vmatprep.mubr.msk.f32.mxu0 %vm277_vm10, %v272_v63 }
 0x2b7   :  { %456 = vmatmul.mubr.msk.f32.vlgmr.msra.gmra.mrb[4].mxu0 %vm277_vm10, %v273_v0 }
 0x38a   :  { %v457_v1 = vpop.f32.mrb[4].mxu0 }
 0x38b   :  { %364 = vst.msk [vmem:[%s619_s3 + $0x8] sm:$0xff] %vm362_vm11, %v457_v1  ;;  %v353_v2 = vpop.f32.mrb[5].mxu0 }
 0x38c   :  { %363 = vst.msk [vmem:[%s619_s3] sm:$0xff] %vm362_vm11, %v353_v2 }

</bundles_post_ra>
